<compile_context>
chip_gen: v7x
topology: tpu7x:2x2x1
jax: 0.10.0
libtpu: 0.0.40
codegen_flags: <defaults>
</compile_context>

<pallas_src>
from functools import partial

import jax
import jax.numpy as jnp
from jax.experimental import pallas as pl
from jax.experimental.pallas import tpu as pltpu


# ---------------------------------------------------------------------------
# Fused kernel: conv1+BN1+ReLU -> conv2(3x3)+BN2+ReLU -> conv3+BN3+res+ReLU
# ---------------------------------------------------------------------------

def _bottleneck_kernel(x_ref, w1_ref, s1_ref, w2_ref, s2_ref, w3_ref, s3_ref,
                       mask_ref, o_ref, *, W):
    # x_ref:    (1, C_in, S)          input image, spatial (H*W) on lanes, f32
    # w1_ref:   (planes, C_in)        bf16, BN1 scale folded in
    # s1_ref:   (planes, 1)           f32 BN1 shift
    # w2_ref:   (9, planes, planes)   bf16, tap-major, BN2 scale folded in
    # s2_ref:   (planes, 1)           f32 BN2 shift
    # w3_ref:   (C_out, planes)       bf16, BN3 scale folded in
    # s3_ref:   (C_out, 1)            f32 BN3 shift
    # mask_ref: (9, 1, S)             bf16 {0,1} tap validity (conv padding)
    # o_ref:    (1, C_out, S)         f32 output
    planes = w1_ref.shape[0]
    S = x_ref.shape[2]

    x_f32 = x_ref[0]                                   # residual path, f32
    x_bf = x_f32.astype(jnp.bfloat16)

    # --- stage 1: 1x1 conv + BN1 + ReLU (MXU, f32 accumulate) -------------
    a1 = jnp.dot(w1_ref[...], x_bf, preferred_element_type=jnp.float32)
    a1 = jnp.maximum(a1 + s1_ref[...], 0.0)            # (planes, S) f32

    # --- stage 2: 3x3 conv (pad=1) + BN2 + ReLU ---------------------------
    # Each tap input is a lane shift of a1 along the flattened H*W axis; the
    # precomputed mask zeroes padded positions (and any roll wrap-around).
    acc = jnp.zeros((planes, S), jnp.float32)
    for di in range(3):
        for dj in range(3):
            k = di * 3 + dj
            off = (di - 1) * W + (dj - 1)
            tap = a1 if off == 0 else pltpu.roll(a1, shift=(-off) % S, axis=1)
            tap = tap.astype(jnp.bfloat16)
            if k != 4:                                  # centre tap: no mask
                tap = tap * mask_ref[k]                 # (planes,S) * (1,S)
            acc = acc + jnp.dot(w2_ref[k], tap,
                                preferred_element_type=jnp.float32)
    a2 = jnp.maximum(acc + s2_ref[...], 0.0).astype(jnp.bfloat16)

    # --- stage 3: 1x1 conv + BN3 + residual add + ReLU --------------------
    y = jnp.dot(w3_ref[...], a2, preferred_element_type=jnp.float32)
    y = y + s3_ref[...] + x_f32
    o_ref[0] = jnp.maximum(y, 0.0).astype(o_ref.dtype)


# ---------------------------------------------------------------------------
# Wrapper helpers
# ---------------------------------------------------------------------------

def _vmem_limit_bytes():
    """Generation-aware scoped-VMEM limit (leave ~25% headroom, cap 100 MiB)."""
    cap = 64 * 1024 * 1024
    try:
        info = pltpu.get_tpu_info()
        cap = int(getattr(info, "vmem_capacity_bytes", cap))
    except Exception:
        pass
    return int(max(32 * 1024 * 1024, min(cap * 3 // 4, 100 * 1024 * 1024)))


def _fold_bn(w, gamma, beta, mean, var, *, eps, out_axis):
    """Fold eval-mode BatchNorm into conv weights (bf16) + f32 additive shift."""
    scale = gamma / jnp.sqrt(var + eps)                       # (C_out,)
    bshape = [1] * w.ndim
    bshape[out_axis] = -1
    w_folded = (w * scale.reshape(bshape)).astype(jnp.bfloat16)
    shift = (beta - mean * scale)[:, None].astype(jnp.float32)   # (C_out, 1)
    return w_folded, shift


def _tap_masks(H, W):
    """(9, 1, H*W) bf16 {0,1}: validity of each 3x3 tap under padding=1."""
    rr = jnp.arange(H)[:, None]
    cc = jnp.arange(W)[None, :]
    masks = []
    for di in range(3):
        for dj in range(3):
            valid = ((rr + di - 1 >= 0) & (rr + di - 1 < H) &
                     (cc + dj - 1 >= 0) & (cc + dj - 1 < W))
            masks.append(valid.reshape(1, 1, H * W))
    return jnp.concatenate(masks, axis=0).astype(jnp.bfloat16)


def bottleneck_forward(x, w1, bn1, w2, bn2, w3, bn3, *, stride=1, eps=1e-5):
    """Bottleneck forward pass (downsample=None, eval-mode BN).

    x: (N, inplanes, H, W) f32
    w1: (planes, inplanes, 1, 1); w2: (planes, planes, 3, 3);
    w3: (4*planes, planes, 1, 1); bn* = (gamma, beta, running_mean, running_var)
    """
    N, C_in, H, W = x.shape
    planes = w1.shape[0]
    C_out = w3.shape[0]
    assert stride == 1 and C_in == C_out, (
        "downsample=None requires stride=1 and inplanes == 4*planes")
    S = H * W

    w1_mat, shift1 = _fold_bn(w1.reshape(planes, C_in), *bn1,
                              eps=eps, out_axis=0)
    # weight (O, I, 3, 3) -> tap-major (9, O, I), BN2 scale on O
    w2_taps = jnp.transpose(w2, (2, 3, 0, 1)).reshape(9, planes, planes)
    w2_mat, shift2 = _fold_bn(w2_taps, *bn2, eps=eps, out_axis=1)
    w3_mat, shift3 = _fold_bn(w3.reshape(C_out, planes), *bn3,
                              eps=eps, out_axis=0)
    masks = _tap_masks(H, W)

    out = pl.pallas_call(
        partial(_bottleneck_kernel, W=W),
        out_shape=jax.ShapeDtypeStruct((N, C_out, S), jnp.float32),
        grid_spec=pltpu.PrefetchScalarGridSpec(
            num_scalar_prefetch=0,
            grid=(N,),
            in_specs=[
                pl.BlockSpec((1, C_in, S), lambda n: (n, 0, 0)),         # x
                pl.BlockSpec((planes, C_in), lambda n: (0, 0)),          # w1
                pl.BlockSpec((planes, 1), lambda n: (0, 0)),             # s1
                pl.BlockSpec((9, planes, planes), lambda n: (0, 0, 0)),  # w2
                pl.BlockSpec((planes, 1), lambda n: (0, 0)),             # s2
                pl.BlockSpec((C_out, planes), lambda n: (0, 0)),         # w3
                pl.BlockSpec((C_out, 1), lambda n: (0, 0)),              # s3
                pl.BlockSpec((9, 1, S), lambda n: (0, 0, 0)),            # masks
            ],
            out_specs=pl.BlockSpec((1, C_out, S), lambda n: (n, 0, 0)),
        ),
        compiler_params=pltpu.CompilerParams(
            dimension_semantics=("parallel",),
            vmem_limit_bytes=_vmem_limit_bytes(),
        ),
    )(x.reshape(N, C_in, S), w1_mat, shift1, w2_mat, shift2,
      w3_mat, shift3, masks)

    return out.reshape(N, C_out, H, W)


# ---------------------------------------------------------------------------
# Pure-JAX reference (matches the PyTorch module in eval mode)
# ---------------------------------------------------------------------------

def _ref_bottleneck(x, w1, bn1, w2, bn2, w3, bn3, eps=1e-5):
    def bn(y, p):
        g, b, m, v = p
        g, b, m, v = (t[None, :, None, None] for t in (g, b, m, v))
        return (y - m) / jnp.sqrt(v + eps) * g + b

    dn = ('NCHW', 'OIHW', 'NCHW')
    y = jax.lax.conv_general_dilated(x, w1, (1, 1), 'VALID', dimension_numbers=dn)
    y = jnp.maximum(bn(y, bn1), 0.0)
    y = jax.lax.conv_general_dilated(y, w2, (1, 1), ((1, 1), (1, 1)),
                                     dimension_numbers=dn)
    y = jnp.maximum(bn(y, bn2), 0.0)
    y = jax.lax.conv_general_dilated(y, w3, (1, 1), 'VALID', dimension_numbers=dn)
    y = bn(y, bn3) + x
    return jnp.maximum(y, 0.0)


# ---------------------------------------------------------------------------

if __name__ == "__main__":
    key = jax.random.PRNGKey(0)
    ks = jax.random.split(key, 8)

    N, planes, H, W = 2, 4, 16, 16
    inplanes = planes * 4                       # identity shortcut is valid

    x = jax.random.normal(ks[0], (N, inplanes, H, W), jnp.float32)
    w1 = jax.random.normal(ks[1], (planes, inplanes, 1, 1), jnp.float32) * 0.2
    w2 = jax.random.normal(ks[2], (planes, planes, 3, 3), jnp.float32) * 0.2
    w3 = jax.random.normal(ks[3], (planes * 4, planes, 1, 1), jnp.float32) * 0.2

    def bn_params(k, c):
        k1, k2, k3, k4 = jax.random.split(k, 4)
        gamma = 1.0 + 0.1 * jax.random.normal(k1, (c,), jnp.float32)
        beta = 0.1 * jax.random.normal(k2, (c,), jnp.float32)
        mean = 0.1 * jax.random.normal(k3, (c,), jnp.float32)
        var = jax.random.uniform(k4, (c,), jnp.float32, minval=0.5, maxval=1.5)
        return gamma, beta, mean, var

    bn1 = bn_params(ks[4], planes)
    bn2 = bn_params(ks[5], planes)
    bn3 = bn_params(ks[6], planes * 4)

    out = bottleneck_forward(x, w1, bn1, w2, bn2, w3, bn3)
    out = jax.block_until_ready(out)

    ref = _ref_bottleneck(x, w1, bn1, w2, bn2, w3, bn3)
    assert out.shape == ref.shape, (out.shape, ref.shape)
    # bf16 MXU operands with f32 accumulation -> loose-but-meaningful tolerance
    err = float(jnp.max(jnp.abs(out - ref)))
    assert jnp.allclose(out, ref, atol=5e-2, rtol=5e-2), (
        "mismatch vs reference, max abs diff = %f" % err)

    print("KERNEL_OK")
</pallas_src>

<mosaic_0001>
module attributes {stable_mosaic.version = 11 : i64} {
  func.func @_bottleneck_kernel(%arg0: i32, %arg1: memref<1x16x256xf32, #tpu.memory_space<vmem>>, %arg2: memref<4x16xbf16, #tpu.memory_space<vmem>>, %arg3: memref<4x1xf32, #tpu.memory_space<vmem>>, %arg4: memref<9x4x4xbf16, #tpu.memory_space<vmem>>, %arg5: memref<4x1xf32, #tpu.memory_space<vmem>>, %arg6: memref<16x4xbf16, #tpu.memory_space<vmem>>, %arg7: memref<16x1xf32, #tpu.memory_space<vmem>>, %arg8: memref<9x1x256xbf16, #tpu.memory_space<vmem>>, %arg9: memref<1x16x256xf32, #tpu.memory_space<vmem>>) attributes {dimension_semantics = [#tpu.dimension_semantics<parallel>], iteration_bounds = array<i64: 2>, scalar_prefetch = 0 : i64, scratch_operands = 0 : i64, tpu.core_type = #tpu.core_type<tc>, window_params = [{transform_indices = @transform_0, window_bounds = array<i64: 1, 16, 256>}, {pipeline_mode = #tpu.pipeline_mode<synchronous>, transform_indices = @transform_1, window_bounds = array<i64: 4, 16>}, {pipeline_mode = #tpu.pipeline_mode<synchronous>, transform_indices = @transform_2, window_bounds = array<i64: 4, 1>}, {pipeline_mode = #tpu.pipeline_mode<synchronous>, transform_indices = @transform_3, window_bounds = array<i64: 9, 4, 4>}, {pipeline_mode = #tpu.pipeline_mode<synchronous>, transform_indices = @transform_4, window_bounds = array<i64: 4, 1>}, {pipeline_mode = #tpu.pipeline_mode<synchronous>, transform_indices = @transform_5, window_bounds = array<i64: 16, 4>}, {pipeline_mode = #tpu.pipeline_mode<synchronous>, transform_indices = @transform_6, window_bounds = array<i64: 16, 1>}, {pipeline_mode = #tpu.pipeline_mode<synchronous>, transform_indices = @transform_7, window_bounds = array<i64: 9, 1, 256>}, {transform_indices = @transform_8, window_bounds = array<i64: 1, 16, 256>}]} {
    %c0 = arith.constant 0 : index
    %c0_0 = arith.constant 0 : index
    %c0_1 = arith.constant 0 : index
    %0 = vector.load %arg1[%c0, %c0_0, %c0_1] : memref<1x16x256xf32, #tpu.memory_space<vmem>>, vector<1x16x256xf32>
    %1 = vector.shape_cast %0 : vector<1x16x256xf32> to vector<16x256xf32>
    %2 = arith.truncf %1 : vector<16x256xf32> to vector<16x256xbf16>
    %c0_2 = arith.constant 0 : index
    %c0_3 = arith.constant 0 : index
    %3 = vector.load %arg2[%c0_2, %c0_3] : memref<4x16xbf16, #tpu.memory_space<vmem>>, vector<4x16xbf16>
    %cst = arith.constant dense<0.000000e+00> : vector<4x256xf32>
    %4 = tpu.matmul %3, %2, %cst {dimension_numbers = #tpu.dot_dimension_numbers<[1], [0], [0], [1], [0, 0, 1, 1], [], []>} : vector<4x16xbf16>, vector<16x256xbf16>, vector<4x256xf32> -> vector<4x256xf32>
    %c0_4 = arith.constant 0 : index
    %c0_5 = arith.constant 0 : index
    %5 = vector.load %arg3[%c0_4, %c0_5] : memref<4x1xf32, #tpu.memory_space<vmem>>, vector<4x1xf32>
    %6 = vector.broadcast %5 : vector<4x1xf32> to vector<4x256xf32>
    %7 = arith.addf %4, %6 : vector<4x256xf32>
    %cst_6 = arith.constant 0.000000e+00 : f32
    %8 = vector.broadcast %cst_6 : f32 to vector<4x256xf32>
    %9 = arith.maximumf %7, %8 : vector<4x256xf32>
    %cst_7 = arith.constant 0.000000e+00 : f32
    %10 = vector.broadcast %cst_7 : f32 to vector<4x256xf32>
    %c17_i32 = arith.constant 17 : i32
    %11 = tpu.dynamic_rotate %9 by %c17_i32 dim 1 : vector<4x256xf32>, i32 -> vector<4x256xf32>
    %12 = arith.truncf %11 : vector<4x256xf32> to vector<4x256xbf16>
    %c0_8 = arith.constant 0 : index
    %c0_9 = arith.constant 0 : index
    %c0_10 = arith.constant 0 : index
    %13 = vector.load %arg8[%c0_8, %c0_9, %c0_10] : memref<9x1x256xbf16, #tpu.memory_space<vmem>>, vector<1x1x256xbf16>
    %14 = vector.shape_cast %13 : vector<1x1x256xbf16> to vector<1x256xbf16>
    %15 = vector.broadcast %14 : vector<1x256xbf16> to vector<4x256xbf16>
    %16 = arith.mulf %12, %15 : vector<4x256xbf16>
    %c0_11 = arith.constant 0 : index
    %c0_12 = arith.constant 0 : index
    %c0_13 = arith.constant 0 : index
    %17 = vector.load %arg4[%c0_11, %c0_12, %c0_13] : memref<9x4x4xbf16, #tpu.memory_space<vmem>>, vector<1x4x4xbf16>
    %18 = vector.shape_cast %17 : vector<1x4x4xbf16> to vector<4x4xbf16>
    %cst_14 = arith.constant dense<0.000000e+00> : vector<4x256xf32>
    %19 = tpu.matmul %18, %16, %cst_14 {dimension_numbers = #tpu.dot_dimension_numbers<[1], [0], [0], [1], [0, 0, 1, 1], [], []>} : vector<4x4xbf16>, vector<4x256xbf16>, vector<4x256xf32> -> vector<4x256xf32>
    %20 = arith.addf %10, %19 : vector<4x256xf32>
    %c16_i32 = arith.constant 16 : i32
    %21 = tpu.dynamic_rotate %9 by %c16_i32 dim 1 : vector<4x256xf32>, i32 -> vector<4x256xf32>
    %22 = arith.truncf %21 : vector<4x256xf32> to vector<4x256xbf16>
    %c1 = arith.constant 1 : index
    %c0_15 = arith.constant 0 : index
    %c0_16 = arith.constant 0 : index
    %23 = vector.load %arg8[%c1, %c0_15, %c0_16] : memref<9x1x256xbf16, #tpu.memory_space<vmem>>, vector<1x1x256xbf16>
    %24 = vector.shape_cast %23 : vector<1x1x256xbf16> to vector<1x256xbf16>
    %25 = vector.broadcast %24 : vector<1x256xbf16> to vector<4x256xbf16>
    %26 = arith.mulf %22, %25 : vector<4x256xbf16>
    %c1_17 = arith.constant 1 : index
    %c0_18 = arith.constant 0 : index
    %c0_19 = arith.constant 0 : index
    %27 = vector.load %arg4[%c1_17, %c0_18, %c0_19] : memref<9x4x4xbf16, #tpu.memory_space<vmem>>, vector<1x4x4xbf16>
    %28 = vector.shape_cast %27 : vector<1x4x4xbf16> to vector<4x4xbf16>
    %cst_20 = arith.constant dense<0.000000e+00> : vector<4x256xf32>
    %29 = tpu.matmul %28, %26, %cst_20 {dimension_numbers = #tpu.dot_dimension_numbers<[1], [0], [0], [1], [0, 0, 1, 1], [], []>} : vector<4x4xbf16>, vector<4x256xbf16>, vector<4x256xf32> -> vector<4x256xf32>
    %30 = arith.addf %20, %29 : vector<4x256xf32>
    %c15_i32 = arith.constant 15 : i32
    %31 = tpu.dynamic_rotate %9 by %c15_i32 dim 1 : vector<4x256xf32>, i32 -> vector<4x256xf32>
    %32 = arith.truncf %31 : vector<4x256xf32> to vector<4x256xbf16>
    %c2 = arith.constant 2 : index
    %c0_21 = arith.constant 0 : index
    %c0_22 = arith.constant 0 : index
    %33 = vector.load %arg8[%c2, %c0_21, %c0_22] : memref<9x1x256xbf16, #tpu.memory_space<vmem>>, vector<1x1x256xbf16>
    %34 = vector.shape_cast %33 : vector<1x1x256xbf16> to vector<1x256xbf16>
    %35 = vector.broadcast %34 : vector<1x256xbf16> to vector<4x256xbf16>
    %36 = arith.mulf %32, %35 : vector<4x256xbf16>
    %c2_23 = arith.constant 2 : index
    %c0_24 = arith.constant 0 : index
    %c0_25 = arith.constant 0 : index
    %37 = vector.load %arg4[%c2_23, %c0_24, %c0_25] : memref<9x4x4xbf16, #tpu.memory_space<vmem>>, vector<1x4x4xbf16>
    %38 = vector.shape_cast %37 : vector<1x4x4xbf16> to vector<4x4xbf16>
    %cst_26 = arith.constant dense<0.000000e+00> : vector<4x256xf32>
    %39 = tpu.matmul %38, %36, %cst_26 {dimension_numbers = #tpu.dot_dimension_numbers<[1], [0], [0], [1], [0, 0, 1, 1], [], []>} : vector<4x4xbf16>, vector<4x256xbf16>, vector<4x256xf32> -> vector<4x256xf32>
    %40 = arith.addf %30, %39 : vector<4x256xf32>
    %c1_i32 = arith.constant 1 : i32
    %41 = tpu.dynamic_rotate %9 by %c1_i32 dim 1 : vector<4x256xf32>, i32 -> vector<4x256xf32>
    %42 = arith.truncf %41 : vector<4x256xf32> to vector<4x256xbf16>
    %c3 = arith.constant 3 : index
    %c0_27 = arith.constant 0 : index
    %c0_28 = arith.constant 0 : index
    %43 = vector.load %arg8[%c3, %c0_27, %c0_28] : memref<9x1x256xbf16, #tpu.memory_space<vmem>>, vector<1x1x256xbf16>
    %44 = vector.shape_cast %43 : vector<1x1x256xbf16> to vector<1x256xbf16>
    %45 = vector.broadcast %44 : vector<1x256xbf16> to vector<4x256xbf16>
    %46 = arith.mulf %42, %45 : vector<4x256xbf16>
    %c3_29 = arith.constant 3 : index
    %c0_30 = arith.constant 0 : index
    %c0_31 = arith.constant 0 : index
    %47 = vector.load %arg4[%c3_29, %c0_30, %c0_31] : memref<9x4x4xbf16, #tpu.memory_space<vmem>>, vector<1x4x4xbf16>
    %48 = vector.shape_cast %47 : vector<1x4x4xbf16> to vector<4x4xbf16>
    %cst_32 = arith.constant dense<0.000000e+00> : vector<4x256xf32>
    %49 = tpu.matmul %48, %46, %cst_32 {dimension_numbers = #tpu.dot_dimension_numbers<[1], [0], [0], [1], [0, 0, 1, 1], [], []>} : vector<4x4xbf16>, vector<4x256xbf16>, vector<4x256xf32> -> vector<4x256xf32>
    %50 = arith.addf %40, %49 : vector<4x256xf32>
    %51 = arith.truncf %9 : vector<4x256xf32> to vector<4x256xbf16>
    %c4 = arith.constant 4 : index
    %c0_33 = arith.constant 0 : index
    %c0_34 = arith.constant 0 : index
    %52 = vector.load %arg4[%c4, %c0_33, %c0_34] : memref<9x4x4xbf16, #tpu.memory_space<vmem>>, vector<1x4x4xbf16>
    %53 = vector.shape_cast %52 : vector<1x4x4xbf16> to vector<4x4xbf16>
    %cst_35 = arith.constant dense<0.000000e+00> : vector<4x256xf32>
    %54 = tpu.matmul %53, %51, %cst_35 {dimension_numbers = #tpu.dot_dimension_numbers<[1], [0], [0], [1], [0, 0, 1, 1], [], []>} : vector<4x4xbf16>, vector<4x256xbf16>, vector<4x256xf32> -> vector<4x256xf32>
    %55 = arith.addf %50, %54 : vector<4x256xf32>
    %c255_i32 = arith.constant 255 : i32
    %56 = tpu.dynamic_rotate %9 by %c255_i32 dim 1 : vector<4x256xf32>, i32 -> vector<4x256xf32>
    %57 = arith.truncf %56 : vector<4x256xf32> to vector<4x256xbf16>
    %c5 = arith.constant 5 : index
    %c0_36 = arith.constant 0 : index
    %c0_37 = arith.constant 0 : index
    %58 = vector.load %arg8[%c5, %c0_36, %c0_37] : memref<9x1x256xbf16, #tpu.memory_space<vmem>>, vector<1x1x256xbf16>
    %59 = vector.shape_cast %58 : vector<1x1x256xbf16> to vector<1x256xbf16>
    %60 = vector.broadcast %59 : vector<1x256xbf16> to vector<4x256xbf16>
    %61 = arith.mulf %57, %60 : vector<4x256xbf16>
    %c5_38 = arith.constant 5 : index
    %c0_39 = arith.constant 0 : index
    %c0_40 = arith.constant 0 : index
    %62 = vector.load %arg4[%c5_38, %c0_39, %c0_40] : memref<9x4x4xbf16, #tpu.memory_space<vmem>>, vector<1x4x4xbf16>
    %63 = vector.shape_cast %62 : vector<1x4x4xbf16> to vector<4x4xbf16>
    %cst_41 = arith.constant dense<0.000000e+00> : vector<4x256xf32>
    %64 = tpu.matmul %63, %61, %cst_41 {dimension_numbers = #tpu.dot_dimension_numbers<[1], [0], [0], [1], [0, 0, 1, 1], [], []>} : vector<4x4xbf16>, vector<4x256xbf16>, vector<4x256xf32> -> vector<4x256xf32>
    %65 = arith.addf %55, %64 : vector<4x256xf32>
    %c241_i32 = arith.constant 241 : i32
    %66 = tpu.dynamic_rotate %9 by %c241_i32 dim 1 : vector<4x256xf32>, i32 -> vector<4x256xf32>
    %67 = arith.truncf %66 : vector<4x256xf32> to vector<4x256xbf16>
    %c6 = arith.constant 6 : index
    %c0_42 = arith.constant 0 : index
    %c0_43 = arith.constant 0 : index
    %68 = vector.load %arg8[%c6, %c0_42, %c0_43] : memref<9x1x256xbf16, #tpu.memory_space<vmem>>, vector<1x1x256xbf16>
    %69 = vector.shape_cast %68 : vector<1x1x256xbf16> to vector<1x256xbf16>
    %70 = vector.broadcast %69 : vector<1x256xbf16> to vector<4x256xbf16>
    %71 = arith.mulf %67, %70 : vector<4x256xbf16>
    %c6_44 = arith.constant 6 : index
    %c0_45 = arith.constant 0 : index
    %c0_46 = arith.constant 0 : index
    %72 = vector.load %arg4[%c6_44, %c0_45, %c0_46] : memref<9x4x4xbf16, #tpu.memory_space<vmem>>, vector<1x4x4xbf16>
    %73 = vector.shape_cast %72 : vector<1x4x4xbf16> to vector<4x4xbf16>
    %cst_47 = arith.constant dense<0.000000e+00> : vector<4x256xf32>
    %74 = tpu.matmul %73, %71, %cst_47 {dimension_numbers = #tpu.dot_dimension_numbers<[1], [0], [0], [1], [0, 0, 1, 1], [], []>} : vector<4x4xbf16>, vector<4x256xbf16>, vector<4x256xf32> -> vector<4x256xf32>
    %75 = arith.addf %65, %74 : vector<4x256xf32>
    %c240_i32 = arith.constant 240 : i32
    %76 = tpu.dynamic_rotate %9 by %c240_i32 dim 1 : vector<4x256xf32>, i32 -> vector<4x256xf32>
    %77 = arith.truncf %76 : vector<4x256xf32> to vector<4x256xbf16>
    %c7 = arith.constant 7 : index
    %c0_48 = arith.constant 0 : index
    %c0_49 = arith.constant 0 : index
    %78 = vector.load %arg8[%c7, %c0_48, %c0_49] : memref<9x1x256xbf16, #tpu.memory_space<vmem>>, vector<1x1x256xbf16>
    %79 = vector.shape_cast %78 : vector<1x1x256xbf16> to vector<1x256xbf16>
    %80 = vector.broadcast %79 : vector<1x256xbf16> to vector<4x256xbf16>
    %81 = arith.mulf %77, %80 : vector<4x256xbf16>
    %c7_50 = arith.constant 7 : index
    %c0_51 = arith.constant 0 : index
    %c0_52 = arith.constant 0 : index
    %82 = vector.load %arg4[%c7_50, %c0_51, %c0_52] : memref<9x4x4xbf16, #tpu.memory_space<vmem>>, vector<1x4x4xbf16>
    %83 = vector.shape_cast %82 : vector<1x4x4xbf16> to vector<4x4xbf16>
    %cst_53 = arith.constant dense<0.000000e+00> : vector<4x256xf32>
    %84 = tpu.matmul %83, %81, %cst_53 {dimension_numbers = #tpu.dot_dimension_numbers<[1], [0], [0], [1], [0, 0, 1, 1], [], []>} : vector<4x4xbf16>, vector<4x256xbf16>, vector<4x256xf32> -> vector<4x256xf32>
    %85 = arith.addf %75, %84 : vector<4x256xf32>
    %c239_i32 = arith.constant 239 : i32
    %86 = tpu.dynamic_rotate %9 by %c239_i32 dim 1 : vector<4x256xf32>, i32 -> vector<4x256xf32>
    %87 = arith.truncf %86 : vector<4x256xf32> to vector<4x256xbf16>
    %c8 = arith.constant 8 : index
    %c0_54 = arith.constant 0 : index
    %c0_55 = arith.constant 0 : index
    %88 = vector.load %arg8[%c8, %c0_54, %c0_55] : memref<9x1x256xbf16, #tpu.memory_space<vmem>>, vector<1x1x256xbf16>
    %89 = vector.shape_cast %88 : vector<1x1x256xbf16> to vector<1x256xbf16>
    %90 = vector.broadcast %89 : vector<1x256xbf16> to vector<4x256xbf16>
    %91 = arith.mulf %87, %90 : vector<4x256xbf16>
    %c8_56 = arith.constant 8 : index
    %c0_57 = arith.constant 0 : index
    %c0_58 = arith.constant 0 : index
    %92 = vector.load %arg4[%c8_56, %c0_57, %c0_58] : memref<9x4x4xbf16, #tpu.memory_space<vmem>>, vector<1x4x4xbf16>
    %93 = vector.shape_cast %92 : vector<1x4x4xbf16> to vector<4x4xbf16>
    %cst_59 = arith.constant dense<0.000000e+00> : vector<4x256xf32>
    %94 = tpu.matmul %93, %91, %cst_59 {dimension_numbers = #tpu.dot_dimension_numbers<[1], [0], [0], [1], [0, 0, 1, 1], [], []>} : vector<4x4xbf16>, vector<4x256xbf16>, vector<4x256xf32> -> vector<4x256xf32>
    %95 = arith.addf %85, %94 : vector<4x256xf32>
    %c0_60 = arith.constant 0 : index
    %c0_61 = arith.constant 0 : index
    %96 = vector.load %arg5[%c0_60, %c0_61] : memref<4x1xf32, #tpu.memory_space<vmem>>, vector<4x1xf32>
    %97 = vector.broadcast %96 : vector<4x1xf32> to vector<4x256xf32>
    %98 = arith.addf %95, %97 : vector<4x256xf32>
    %cst_62 = arith.constant 0.000000e+00 : f32
    %99 = vector.broadcast %cst_62 : f32 to vector<4x256xf32>
    %100 = arith.maximumf %98, %99 : vector<4x256xf32>
    %101 = arith.truncf %100 : vector<4x256xf32> to vector<4x256xbf16>
    %c0_63 = arith.constant 0 : index
    %c0_64 = arith.constant 0 : index
    %102 = vector.load %arg6[%c0_63, %c0_64] : memref<16x4xbf16, #tpu.memory_space<vmem>>, vector<16x4xbf16>
    %cst_65 = arith.constant dense<0.000000e+00> : vector<16x256xf32>
    %103 = tpu.matmul %102, %101, %cst_65 {dimension_numbers = #tpu.dot_dimension_numbers<[1], [0], [0], [1], [0, 0, 1, 1], [], []>} : vector<16x4xbf16>, vector<4x256xbf16>, vector<16x256xf32> -> vector<16x256xf32>
    %c0_66 = arith.constant 0 : index
    %c0_67 = arith.constant 0 : index
    %104 = vector.load %arg7[%c0_66, %c0_67] : memref<16x1xf32, #tpu.memory_space<vmem>>, vector<16x1xf32>
    %105 = vector.broadcast %104 : vector<16x1xf32> to vector<16x256xf32>
    %106 = arith.addf %103, %105 : vector<16x256xf32>
    %107 = arith.addf %106, %1 : vector<16x256xf32>
    %cst_68 = arith.constant 0.000000e+00 : f32
    %108 = vector.broadcast %cst_68 : f32 to vector<16x256xf32>
    %109 = arith.maximumf %107, %108 : vector<16x256xf32>
    %c0_69 = arith.constant 0 : index
    %c0_70 = arith.constant 0 : index
    %c0_71 = arith.constant 0 : index
    %110 = vector.load %arg9[%c0_69, %c0_70, %c0_71] : memref<1x16x256xf32, #tpu.memory_space<vmem>>, vector<1x16x256xf32>
    %111 = vector.shape_cast %110 : vector<1x16x256xf32> to vector<16x256xf32>
    %112 = vector.shape_cast %109 : vector<16x256xf32> to vector<1x16x256xf32>
    tpu.vector_store %arg9[%c0_69, %c0_70, %c0_71], %112 {strides = array<i32>} : memref<1x16x256xf32, #tpu.memory_space<vmem>>, vector<1x16x256xf32>,
    return
  }
  func.func @transform_0(%arg0: i32) -> (i32, i32, i32) {
    %c0_i32 = arith.constant 0 : i32
    %c0_i32_0 = arith.constant 0 : i32
    %c0_i32_1 = arith.constant 0 : i32
    return %arg0, %c0_i32, %c0_i32_0 : i32, i32, i32
  }
  func.func @transform_1(%arg0: i32) -> (i32, i32) {
    %c0_i32 = arith.constant 0 : i32
    %c0_i32_0 = arith.constant 0 : i32
    %c0_i32_1 = arith.constant 0 : i32
    return %c0_i32, %c0_i32_0 : i32, i32
  }
  func.func @transform_2(%arg0: i32) -> (i32, i32) {
    %c0_i32 = arith.constant 0 : i32
    %c0_i32_0 = arith.constant 0 : i32
    %c0_i32_1 = arith.constant 0 : i32
    return %c0_i32, %c0_i32_0 : i32, i32
  }
  func.func @transform_3(%arg0: i32) -> (i32, i32, i32) {
    %c0_i32 = arith.constant 0 : i32
    %c0_i32_0 = arith.constant 0 : i32
    %c0_i32_1 = arith.constant 0 : i32
    %c0_i32_2 = arith.constant 0 : i32
    return %c0_i32, %c0_i32_0, %c0_i32_1 : i32, i32, i32
  }
  func.func @transform_4(%arg0: i32) -> (i32, i32) {
    %c0_i32 = arith.constant 0 : i32
    %c0_i32_0 = arith.constant 0 : i32
    %c0_i32_1 = arith.constant 0 : i32
    return %c0_i32, %c0_i32_0 : i32, i32
  }
  func.func @transform_5(%arg0: i32) -> (i32, i32) {
    %c0_i32 = arith.constant 0 : i32
    %c0_i32_0 = arith.constant 0 : i32
    %c0_i32_1 = arith.constant 0 : i32
    return %c0_i32, %c0_i32_0 : i32, i32
  }
  func.func @transform_6(%arg0: i32) -> (i32, i32) {
    %c0_i32 = arith.constant 0 : i32
    %c0_i32_0 = arith.constant 0 : i32
    %c0_i32_1 = arith.constant 0 : i32
    return %c0_i32, %c0_i32_0 : i32, i32
  }
  func.func @transform_7(%arg0: i32) -> (i32, i32, i32) {
    %c0_i32 = arith.constant 0 : i32
    %c0_i32_0 = arith.constant 0 : i32
    %c0_i32_1 = arith.constant 0 : i32
    %c0_i32_2 = arith.constant 0 : i32
    return %c0_i32, %c0_i32_0, %c0_i32_1 : i32, i32, i32
  }
  func.func @transform_8(%arg0: i32) -> (i32, i32, i32) {
    %c0_i32 = arith.constant 0 : i32
    %c0_i32_0 = arith.constant 0 : i32
    %c0_i32_1 = arith.constant 0 : i32
    return %arg0, %c0_i32, %c0_i32_0 : i32, i32, i32
  }
}

</mosaic_0001>

<bundles_post_ra>
// kernel: tpu_custom_call.1
= control target key start
LH: loop header
LB: loop body
LE: loop exit
PB: predicated region body
PF: predicated region fallthrough
CT: control target
= control target key end

     0   :  { %13 = vsyncpa [#allocation3], 0  ;;  %s2040_s0 = inlined_call_operand.vmem [shape: f32[2,16,256], index: 0, kind: input, shape index: {}]   ;;  %s2041_s1 = inlined_call_operand.vmem [shape: bf16[4,16], index: 1, kind: input, shape index: {}]   ;;  %s2042_s2 = inlined_call_operand.vmem [shape: f32[4,1], index: 2, kind: input, shape index: {}]   ;;  %s2043_s3 = inlined_call_operand.vmem [shape: bf16[9,4,4], index: 3, kind: input, shape index: {}]   ;;  %s2044_s4 = inlined_call_operand.vmem [shape: f32[4,1], index: 4, kind: input, shape index: {}]   ;;  %s2045_s5 = inlined_call_operand.vmem [shape: bf16[16,4], index: 5, kind: input, shape index: {}]   ;;  %s2046_s6 = inlined_call_operand.vmem [shape: f32[16,1], index: 6, kind: input, shape index: {}]   ;;  %s2047_s7 = inlined_call_operand.vmem [shape: bf16[9,1,256], index: 7, kind: input, shape index: {}]   ;;  %s2048_s8 = inlined_call_operand.hbm [shape: f32[2,16,256], index: 8, kind: output, shape index: {}]  }
   0x1   :  { %15 = vsyncpa [#allocation3 + $0x1], 0  ;;  %s1695_s27 = smov 0   ;;  %s1697_s28 = smov 0  }
   0x2   :  { %s1699_s29 = smov 0   ;;  %s1701_s30 = smov 0  }
   0x3 LB: > { %s1716_s9 = sadd.s32 4294967295, %s1636_s30   ;;  %s1422_s10 = sadd.s32 4294967294, %s1636_s30   ;;  %s1636_s30 = sphi %s1701_s30, %s2054_s30   ;;  %s1632_s29 = sphi %s1699_s29, %s2053_s29   ;;  %s1628_s28 = sphi %s1697_s28, %s2052_s28   ;;  %s1624_s27 = sphi %s1695_s27, %s2051_s27  }
   0x4   : > { %s1720_s11 = sadd.s32 1, %s1636_s30   ;;  %s201_s12 = sadd.s32 1, %s1632_s29 }
   0x5   : > { %s198_s13 = ssub.s32 %s1636_s30, %s1720_s11  ;;  %p211_p0 = scmp.ne.s32.totalorder %s1632_s29, %s1628_s28 }
   0x6   : > { %p199_p1 = scmp.eq.s32.totalorder %s198_s13, 0  ;;  %p212_p2 = scmp.eq.s32.totalorder %s1716_s9, 1 }
   0x7   : > { %p217_p3 = scmp.ne.s32.totalorder %s1628_s28, %s1624_s27  ;;  %p218_p4 = scmp.eq.s32.totalorder %s1422_s10, 1 }
   0x8   : > { %s1731_s14 = scalar_select %p199_p1, %s1632_s29, %s201_s12  }
   0x9   : > { %p1733_p5 = por %p212_p2, %p211_p0  ;;  %p1737_p6 = por %p218_p4, %p217_p3 }
   0xa   : > { %p1425_p7 = scmp.ge.s32.totalorder %s1636_s30, 1  ;;  %p265_p8 = scmp.lt.s32.totalorder %s1636_s30, 3 }
   0xc   : > { %p266_p9 = pnand %p1425_p7, %p265_p8 }
   0xd   : > { %p299_p10 = scmp.lt.s32.totalorder (!%p266_p9), %s1716_s9, 1  ;;  %v1638_v0 = vmov (!%p266_p9), 0   ;;  %v312_v1 = vld [vmem:[%s2042_s2] sm:$0xf] (!%p266_p9)  ;;  %vm318_vm0 = vcmask (!%p266_p9), 130048   ;;  %s1639_s26 = smov (!%p266_p9), 17   ;;  %v369_v22 = vlaneseq (!%p266_p9) }
   0xe   : > { %269 = sbr.rel (%p266_p9) target bundleno = 871 (0x367), region = 52  ;;  %354 = vmatprep.mubr.bf16.mxu0 (!%p266_p9), %v1638_v0  ;;  %1531 = vset.pattern.permute.xlu0 (!%p266_p9), %v1638_v0  ;;  %v311_v8 = vld [vmem:[%s2041_s1] sm:$0x3] (!%p266_p9)  ;;  %s1640_s10 = smov (!%p266_p9), 16   ;;  %v1266_v21 = vld [vmem:[%s2046_s6 + $0x8] sm:$0xff] (!%p266_p9)  ;;  %vm473_vm5 = vcmask (!%p266_p9), 1041408  }
   0xf   : > { %315 = vperm.xlu0 (!%p266_p9), %1531, %v312_v1   ;;  %512 = vmatprep.mubr.bf16.mxu1 (!%p266_p9), %v1638_v0  ;;  %s1641_s12 = smov (!%p266_p9), 15   ;;  %s1642_s13 = smov (!%p266_p9), 1   ;;  %v1265_v19 = vld [vmem:[%s2046_s6] sm:$0xff] (!%p266_p9)  ;;  %v1647_v23 = vmov (!%p266_p9), 1966171168   ;;  %v390_v26 = vshrl.u32 (!%p266_p9), %v369_v22, 7 }
  0x10   : > { %1572 = vset.pattern.permute.xlu1 (!%p266_p9), %v1638_v0  ;;  %s1643_s17 = smov (!%p266_p9), 127   ;;  %s1644_s18 = smov (!%p266_p9), 113   ;;  %v1251_v20 = vld [vmem:[%s2044_s4] sm:$0xf] (!%p266_p9)  ;;  %v387_v24 = vunpack.c.l.s4 (!%p266_p9), %v1647_v23  ;;  %v1812_v45 = vand.u32 (!%p266_p9), 127, %v369_v22  ;;  %vm469_vm7 = vcmask (!%p266_p9), 31744  }
  0x11   : > { %v1430_v27 = vld.sshfl [vmem:[%s2047_s7] sm:$0x11 pattern:$0x75316420] (!%p266_p9)  ;;  %v1814_v46 = vsub.s32 (!%p266_p9), 0, %v390_v26  ;;  %s1648_s24 = smov (!%p266_p9), [#allocation2]  }
  0x12   : > { %v388_v25 = vunpack.c.0.s8 (!%p266_p9), %v387_v24  ;;  %v1432_v28 = vld.sshfl [vmem:[%s2047_s7 + $0x2] sm:$0x11 pattern:$0x75316420] (!%p266_p9)  ;;  %v385_v32 = vcombine.high (!%p266_p9), %v1430_v27, %v1430_v27  ;;  %vm371_vm1 = vcmp.lt.s32.totalorder (!%p266_p9), %v1812_v45, 17  ;;  %vm421_vm2 = vcmp.lt.s32.totalorder (!%p266_p9), %v1812_v45, 16 }
  0x13   : > { %v1439_v29 = vld.sshfl [vmem:[%s2047_s7 + $0x4] sm:$0x11 pattern:$0x75316420] (!%p266_p9)  ;;  %v436_v33 = vcombine.high (!%p266_p9), %v1432_v28, %v1432_v28  ;;  %vm575_vm3 = vcmp.lt.s32.totalorder (!%p266_p9), %v1812_v45, 15  ;;  %vm679_vm4 = vcmp.lt.s32.totalorder (!%p266_p9), %v1812_v45, 1 }
  0x14   : > { %v1444_v30 = vld.sshfl [vmem:[%s2047_s7 + $0x6] sm:$0x11 pattern:$0x75316420] (!%p266_p9)  ;;  %v1799_v31 = vsub.s32 (!%p266_p9), %v388_v25, %v390_v26  ;;  %v590_v34 = vcombine.high (!%p266_p9), %v1439_v29, %v1439_v29  ;;  %vm839_vm6 = vcmp.lt.s32.totalorder (!%p266_p9), %v1812_v45, 127  ;;  %vm943_vm8 = vcmp.lt.s32.totalorder (!%p266_p9), %v1812_v45, 113 }
  0x15   : > { %s300_s19 = scalar_select %p299_p10, %s1716_s9, 1  ;;  %v694_v35 = vcombine.high %v1444_v30, %v1444_v30  ;;  %v1452_v40 = vld.sshfl [vmem:[%s2047_s7 + $0xa] sm:$0x11 pattern:$0x75316420]  ;;  %vm1047_vm9 = vcmp.lt.s32.totalorder %v1812_v45, 112 }
  0x16   : > { %v399_v36 = vrot.slane %v385_v32, %v1799_v31  ;;  %v450_v37 = vrot.slane %v436_v33, %v1799_v31  ;;  %v443_v38 = vrot.slane %v1432_v28, %v1799_v31  ;;  %v392_v39 = vrot.slane %v1430_v27, %v1799_v31  ;;  %v1829_v59 = vld.sshfl [vmem:[%s2047_s7 + $0xc] sm:$0x11 pattern:$0x75316420]  ;;  %s1578_s25 = sshll.u32 %s1648_s24, 4  ;;  %s1579_s25 = int_to_ptr.vmem [resolvable:$false] %s1578_s25 }
  0x17   : > { %s1479_s20 = sshll.u32 %s300_s19, 5  ;;  %s1645_s19 = smov 112   ;;  %v604_v41 = vrot.slane %v590_v34, %v1799_v31  ;;  %v708_v42 = vrot.slane %v694_v35, %v1799_v31  ;;  %v597_v43 = vrot.slane %v1439_v29, %v1799_v31  ;;  %v701_v44 = vrot.slane %v1444_v30, %v1799_v31  ;;  %v1838_v63 = vld.sshfl [vmem:[%s2047_s7 + $0xe] sm:$0x11 pattern:$0x75316420] }
  0x18   : > { %s303_s23 = scalar_lea.vmem %s2040_s0, %s1479_s20  ;;  %s1646_s20 = smov 111   ;;  %v408_v47 = vpack.i.b16 %v399_v36, %v399_v36  ;;  %v854_v48 = vcombine.high %v1452_v40, %v1452_v40  ;;  %v459_v49 = vpack.i.b16 %v450_v37, %v450_v37  ;;  %v452_v50 = vpack.i.b16 %v443_v38, %v443_v38 }
  0x19   : > { %v1755_v2 = vld [vmem:[%s303_s23 + $0x8] sm:$0xff]  ;;  %v1757_v3 = vld [vmem:[%s303_s23 + $0x18] sm:$0xff]  ;;  %v1759_v4 = vld [vmem:[%s303_s23] sm:$0xff]  ;;  %v401_v51 = vpack.i.b16 %v392_v39, %v392_v39  ;;  %v613_v52 = vpack.i.b16 %v604_v41, %v604_v41  ;;  %v717_v53 = vpack.i.b16 %v708_v42, %v708_v42  ;;  %v606_v54 = vpack.i.b16 %v597_v43, %v597_v43 }
  0x1a   : > { %v310_v5 = vpack.c.bf16 %v1757_v3, %v1755_v2  ;;  %v1763_v6 = vld [vmem:[%s303_s23 + $0x10] sm:$0xff]  ;;  %v710_v55 = vpack.i.b16 %v701_v44, %v701_v44  ;;  %v413_v56 = vrot.slane %v408_v47, %v1814_v46  ;;  %v1821_v57 = vrot.slane %v854_v48, %v1799_v31 }
  0x1b   : > { %v309_v7 = vpack.c.bf16 %v1763_v6, %v1759_v4  ;;  %v1824_v58 = vrot.slane %v1452_v40, %v1799_v31  ;;  %v464_v60 = vrot.slane %v459_v49, %v1814_v46  ;;  %v457_v61 = vrot.slane %v452_v50, %v1814_v46 }
  0x1c   : > { %322 = vmatprep.subr.bf16.mxu0 %v310_v5  ;;  %v406_v62 = vrot.slane %v401_v51, %v1814_v46  ;;  %vm1151_vm10 = vcmp.lt.s32.totalorder %v1812_v45, 111 }
  0x1d   : > { %323 = vmatpush1.bf16.msra.mxu0 %v309_v7  ;;  %v618_v7 = vrot.slane %v613_v52, %v1814_v46 }
  0x20   : > { %1429 = vmatmul.mubr.msk.bf16.vlgmr.msra.gmra.mrb[0].mxu0 %vm318_vm0, %v311_v8  ;;  %v722_v8 = vrot.slane %v717_v53, %v1814_v46 }
  0x21   : > { %562 = vmatprep.mubr.bf16.mxu0 %v1638_v0 }
  0x8e   : > { %v316_v9 = vpop.permute.xlu0 %315 }
  0xf3   : > { %v356_v10 = vpop.f32.mrb[0].mxu0 }
  0xf4   : > { %v357_v11 = vadd.f32 %v356_v10, %v316_v9  ;;  %v358_v12 = vpop.f32.mrb[1].mxu0  ;;  %v1847_v10 = vrot.slane %v710_v55, %v1814_v46 }
  0xf5   : > { %v359_v13 = vadd.f32 %v358_v12, %v316_v9  ;;  %v360_v14 = vpop.f32.mrb[2].mxu0  ;;  %v1844_v9 = vrot.slane %v606_v54, %v1814_v46 }
  0xf6   : > { %v1771_v15 = vmax.f32 %v357_v11, 0.0  ;;  %v361_v16 = vpop.f32.mrb[3].mxu0 }
  0xf7   : > { %v1773_v17 = vmax.f32 %v359_v13, 0.0  ;;  %v877_v16 = vpack.i.b16 %v1821_v57, %v1821_v57 }
  0xf9   : > { %v1537_v18 = vpack.i.bf16 %v1773_v17, %v1771_v15 }
  0xfb   : > { %1538 = vrot.lane.b32.xlu1 %v1537_v18, %s1639_s26  ;;  %1533 = vrot.lane.b32.xlu0 %v1537_v18, %s1640_s10  ;;  %s1580_s26 = scalar_lea.vmem %s1579_s25, 1024 }
  0xff   : > { %1543 = vrot.lane.b32.xlu1 %v1537_v18, %s1641_s12  ;;  %1548 = vrot.lane.b32.xlu0 %v1537_v18, %s1642_s13  ;;  %s296_s12 = sand.u32 1, %s1628_s28  }
 0x100   : > { %s1426_s13 = sshll.u32 %s296_s12, 5 }
 0x103   : > { %1553 = vrot.lane.b32.xlu1 %v1537_v18, %s1643_s17  ;;  %1558 = vrot.lane.b32.xlu0 %v1537_v18, %s1644_s18  ;;  %s298_s17 = scalar_lea.vmem [#allocation2], %s1426_s13 }
 0x104   : > { %s1360_s18 = sshll.u32 %s298_s17, 4  ;;  %s1991_s18 = int_to_ptr.vmem [resolvable:$true] %s1360_s18 }
 0x105   : > { %s1574_s23 = scalar_lea.vmem %s1991_s18, 512  ;;  %p1581_p0 = scmp.lt.s32.totalorder %s1991_s18, %s1579_s25 }
 0x106   : > { %p1575_p11 = scmp.ne.s32.totalorder %s1991_s18, %s1574_s23  ;;  %p1582_p1 = scmp.lt.s32.totalorder %s1580_s26, %s1574_s23 }
 0x107   : > { %1563 = vrot.lane.b32.xlu1 %v1537_v18, %s1645_s19  ;;  %1568 = vrot.lane.b32.xlu0 %v1537_v18, %s1646_s20  ;;  %v870_v18 = vpack.i.b16 %v1824_v58, %v1824_v58  ;;  %s1480_s19 = sshll.u32 %s1716_s9, 9  ;;  %s1998_s9 = scalar_lea.sflag [#allocation3], %s296_s12 }
 0x108   : > { %s1996_s22 = scalar_lea.hbm %s2048_s8, %s1480_s19  ;;  %p1576_p12 = pnand %p1575_p11, %p1733_p5 }
 0x109   : > { %p1583_p2 = por %p1582_p1, %p1581_p0 }
 0x10a   : > { %p1577_p13 = pneg %p1576_p12 }
 0x10b   : > { %1269 = vperm.xlu0 %1531, %v1265_v19   ;;  %1254 = vperm.xlu1 %1572, %v1251_v20   ;;  %v958_v19 = vcombine.high %v1829_v59, %v1829_v59  ;;  %v1062_v20 = vcombine.high %v1838_v63, %v1838_v63 }
 0x10c   : > { %p1584_p3 = pnand %p1583_p2, %p1577_p13 }
 0x10d   : > { %v972_v50 = vrot.slane %v958_v19, %v1799_v31  ;;  %v1076_v51 = vrot.slane %v1062_v20, %v1799_v31  ;;  %v965_v19 = vrot.slane %v1829_v59, %v1799_v31 }
 0x10f   : > { %1274 = vperm.xlu1 %1572, %v1266_v21  }
 0x16d   : > { %v1539_v1 = vpop.permute.xlu1 %1538  ;;  %v1534_v5 = vpop.permute.xlu0 %1533 }
 0x16e   : > { %v1541_v11 = vunpack.i.h.bf16 %v1539_v1  ;;  %v1540_v12 = vunpack.i.l.bf16 %v1539_v1  ;;  %v1536_v13 = vunpack.i.h.bf16 %v1534_v5  ;;  %v1535_v14 = vunpack.i.l.bf16 %v1534_v5  ;;  %v1433_v5 = vld [vmem:[%s2043_s3 + $0x2] sm:$0x3] }
 0x170   : > { %v372_v21 = vsel %vm371_vm1, %v1540_v12, %v1541_v11  ;;  %v373_v22 = vsel %vm371_vm1, %v1541_v11, %v1540_v12  ;;  %v422_v23 = vsel %vm421_vm2, %v1535_v14, %v1536_v13  ;;  %v423_v24 = vsel %vm421_vm2, %v1536_v13, %v1535_v14  ;;  %v1467_v12 = vld.sshfl [vmem:[%s2047_s7 + $0x10] sm:$0x11 pattern:$0x75316420]  ;;  %v416_v14 = vld [vmem:[%s2043_s3] sm:$0x3] }
 0x171   : > { %v374_v25 = vpack.c.bf16 %v373_v22, %v373_v22  ;;  %v375_v26 = vpack.c.bf16 %v372_v21, %v372_v21  ;;  %v1544_v27 = vpop.permute.xlu1 %1543  ;;  %v1549_v28 = vpop.permute.xlu0 %1548  ;;  %v425_v29 = vpack.c.bf16 %v422_v23, %v422_v23  ;;  %v424_v30 = vpack.c.bf16 %v423_v24, %v423_v24 }
 0x172   : > { %v1546_v32 = vunpack.i.h.bf16 %v1544_v27  ;;  %v1545_v33 = vunpack.i.l.bf16 %v1544_v27  ;;  %v1551_v34 = vunpack.i.h.bf16 %v1549_v28  ;;  %v1550_v35 = vunpack.i.l.bf16 %v1549_v28 }
 0x173   : > { %v415_v36 = vmul.bf16 %v413_v56, %v375_v26  ;;  %v466_v37 = vmul.bf16 %v464_v60, %v425_v29  ;;  %v465_v38 = vmul.bf16 %v457_v61, %v424_v30  ;;  %v414_v39 = vmul.bf16 %v406_v62, %v374_v25 }
 0x174   : > { %v576_v40 = vsel %vm575_vm3, %v1545_v33, %v1546_v32  ;;  %v577_v41 = vsel %vm575_vm3, %v1546_v32, %v1545_v33  ;;  %v680_v42 = vsel %vm679_vm4, %v1550_v35, %v1551_v34  ;;  %v681_v43 = vsel %vm679_vm4, %v1551_v34, %v1550_v35 }
 0x175   : > { %v579_v44 = vpack.c.bf16 %v576_v40, %v576_v40  ;;  %v683_v47 = vpack.c.bf16 %v680_v42, %v680_v42  ;;  %v1554_v48 = vpop.permute.xlu1 %1553  ;;  %1436 = vmatprep.subr.msk.bf16.mxu0 %vm473_vm5, %v415_v36  ;;  %v1559_v49 = vpop.permute.xlu0 %1558  ;;  %v578_v52 = vpack.c.bf16 %v577_v41, %v577_v41  ;;  %v682_v53 = vpack.c.bf16 %v681_v43, %v681_v43  ;;  %v1440_v41 = vld [vmem:[%s2043_s3 + $0x4] sm:$0x3] }
 0x176   : > { %v1556_v54 = vunpack.i.h.bf16 %v1554_v48  ;;  %v1555_v55 = vunpack.i.l.bf16 %v1554_v48  ;;  %1434 = vmatprep.subr.msk.bf16.mxu1 %vm473_vm5, %v466_v37  ;;  %v475_v56 = vsel %vm473_vm5, %v465_v38, 0  ;;  %v525_v57 = vsel %vm473_vm5, %v414_v39, 0 }
 0x177   : > { %v620_v58 = vmul.bf16 %v618_v7, %v579_v44  ;;  %v724_v60 = vmul.bf16 %v722_v8, %v683_v47  ;;  %v1561_v62 = vunpack.i.h.bf16 %v1559_v49  ;;  %v1560_v1 = vunpack.i.l.bf16 %v1559_v49  ;;  %481 = vmatpush1.bf16.msra.mxu1 %v475_v56  ;;  %531 = vmatpush1.bf16.msra.mxu0 %v525_v57  ;;  %v1445_v44 = vld [vmem:[%s2043_s3 + $0x6] sm:$0x3] }
 0x178   : > { %v841_v61 = vsel %vm839_vm6, %v1556_v54, %v1555_v55  ;;  %v882_v11 = vrot.slane %v877_v16, %v1814_v46  ;;  %v840_v7 = vsel %vm839_vm6, %v1555_v55, %v1556_v54  ;;  %v1069_v16 = vrot.slane %v1838_v63, %v1799_v31 }
 0x179   : > { %v843_v8 = vpack.c.bf16 %v841_v61, %v841_v61  ;;  %v1564_v13 = vpop.permute.xlu1 %1563  ;;  %1441 = vmatprep.subr.msk.bf16.mxu1 %vm473_vm5, %v620_v58  ;;  %1446 = vmatprep.subr.msk.bf16.mxu0 %vm473_vm5, %v724_v60  ;;  %v875_v22 = vrot.slane %v870_v18, %v1814_v46  ;;  %v1085_v23 = vpack.i.b16 %v1076_v51, %v1076_v51  ;;  %v1569_v18 = vpop.permute.xlu0 %1568 }
 0x17a   : > { %v1566_v20 = vunpack.i.h.bf16 %v1564_v13  ;;  %v1565_v21 = vunpack.i.l.bf16 %v1564_v13  ;;  %1435 = vmatmul.mubr.msk.bf16.vlgmr.msra.gmra.mrb[0].mxu1 %vm469_vm7, %v1433_v5  ;;  %v619_v24 = vmul.bf16 %v1844_v9, %v578_v52  ;;  %v723_v25 = vmul.bf16 %v1847_v10, %v682_v53  ;;  %1437 = vmatmul.mubr.msk.bf16.vlgmr.msra.gmra.mrb[4].mxu0 %vm469_vm7, %v416_v14 }
 0x17b   : > { %v981_v26 = vpack.i.b16 %v972_v50, %v972_v50  ;;  %v1166_v59 = vcombine.high %v1467_v12, %v1467_v12  ;;  %v842_v27 = vpack.c.bf16 %v840_v7, %v840_v7  ;;  %v945_v63 = vsel %vm943_vm8, %v1561_v62, %v1560_v1  ;;  %664 = vmatprep.mubr.bf16.mxu1 %v1638_v0 }
 0x17c   : > { %v1049_v28 = vsel %vm1047_vm9, %v1566_v20, %v1565_v21  ;;  %v884_v29 = vmul.bf16 %v882_v11, %v843_v8  ;;  %v780_v30 = vpack.c.bf16 %v1773_v17, %v1773_v17  ;;  %v779_v9 = vpack.c.bf16 %v1771_v15, %v1771_v15  ;;  %768 = vmatprep.mubr.bf16.mxu0 %v1638_v0  ;;  %v1453_v11 = vld [vmem:[%s2043_s3 + $0xa] sm:$0x3] }
 0x17d   : > { %v974_v10 = vpack.i.b16 %v965_v19, %v965_v19  ;;  %v1078_v32 = vpack.i.b16 %v1069_v16, %v1069_v16  ;;  %v1051_v33 = vpack.c.bf16 %v1049_v28, %v1049_v28  ;;  %v627_v34 = vsel %vm473_vm5, %v619_v24, 0  ;;  %v1458_v19 = vld [vmem:[%s2043_s3 + $0xc] sm:$0x3] }
 0x17e   : > { %v731_v35 = vsel %vm473_vm5, %v723_v25, 0  ;;  %v1090_v36 = vrot.slane %v1085_v23, %v1814_v46  ;;  %v947_v37 = vpack.c.bf16 %v945_v63, %v945_v63  ;;  %633 = vmatpush1.bf16.msra.mxu1 %v627_v34  ;;  %v986_v17 = vrot.slane %v981_v26, %v1814_v46 }
 0x17f   : > { %737 = vmatpush1.bf16.msra.mxu0 %v731_v35  ;;  %v1180_v38 = vrot.slane %v1166_v59, %v1799_v31  ;;  %v944_v15 = vsel %vm943_vm8, %v1560_v1, %v1561_v62  ;;  %v1571_v39 = vunpack.i.h.bf16 %v1569_v18  ;;  %v1570_v40 = vunpack.i.l.bf16 %v1569_v18  ;;  %1449 = vmatprep.subr.msk.bf16.mxu1 %vm473_vm5, %v780_v30  ;;  %v1448_v1 = vld [vmem:[%s2043_s3 + $0x8] sm:$0x3] }
 0x180   : > { %1454 = vmatprep.subr.msk.bf16.mxu0 %vm473_vm5, %v884_v29  ;;  %v883_v42 = vmul.bf16 %v875_v22, %v842_v27  ;;  %v1048_v43 = vsel %vm1047_vm9, %v1565_v21, %v1566_v20  ;;  %v787_v47 = vsel %vm473_vm5, %v779_v9, 0  ;;  %v1092_v48 = vmul.bf16 %v1090_v36, %v1051_v33  ;;  %v1468_v20 = vld [vmem:[%s2043_s3 + $0x10] sm:$0x3] }
 0x181   : > { %v979_v49 = vrot.slane %v974_v10, %v1814_v46  ;;  %v946_v50 = vpack.c.bf16 %v944_v15, %v944_v15  ;;  %v988_v51 = vmul.bf16 %v986_v17, %v947_v37  ;;  %v1189_v52 = vpack.i.b16 %v1180_v38, %v1180_v38 }
 0x182   : > { %1442 = vmatmul.mubr.msk.bf16.vlgmr.msra.gmra.mrb[4].mxu1 %vm469_vm7, %v1440_v41  ;;  %v1173_v53 = vrot.slane %v1467_v12, %v1799_v31  ;;  %v1050_v54 = vpack.c.bf16 %v1048_v43, %v1048_v43  ;;  %v1153_v55 = vsel %vm1151_vm10, %v1571_v39, %v1570_v40  ;;  %1447 = vmatmul.mubr.msk.bf16.vlgmr.msra.gmra.mrb[8].mxu0 %vm469_vm7, %v1445_v44  ;;  %v891_v56 = vsel %vm473_vm5, %v883_v42, 0 }
 0x183   : > { %793 = vmatpush1.bf16.msra.mxu1 %v787_v47  ;;  %v1083_v57 = vrot.slane %v1078_v32, %v1814_v46  ;;  %897 = vmatpush1.bf16.msra.mxu0 %v891_v56  ;;  %v1155_v58 = vpack.c.bf16 %v1153_v55, %v1153_v55  ;;  %v987_v31 = vmul.bf16 %v979_v49, %v946_v50 }
 0x184   : > { %1459 = vmatprep.subr.msk.bf16.mxu1 %vm473_vm5, %v988_v51  ;;  %1464 = vmatprep.subr.msk.bf16.mxu0 %vm473_vm5, %v1092_v48  ;;  %v1194_v60 = vrot.slane %v1189_v52, %v1814_v46  ;;  %v1182_v61 = vpack.i.b16 %v1173_v53, %v1173_v53  ;;  %v1152_v62 = vsel %vm1151_vm10, %v1570_v40, %v1571_v39 }
 0x185   : > { %824 = vmatprep.mubr.bf16.mxu1 %v1638_v0  ;;  %928 = vmatprep.mubr.bf16.mxu0 %v1638_v0  ;;  %v1091_v5 = vmul.bf16 %v1083_v57, %v1050_v54  ;;  %v1154_v12 = vpack.c.bf16 %v1152_v62, %v1152_v62  ;;  %v995_v7 = vsel %vm473_vm5, %v987_v31, 0 }
 0x186   : > { %v1196_v8 = vmul.bf16 %v1194_v60, %v1155_v58  ;;  %v1187_v13 = vrot.slane %v1182_v61, %v1814_v46  ;;  %v1463_v46 = vld [vmem:[%s2043_s3 + $0xe] sm:$0x3] }
 0x187   : > { %v1099_v45 = vsel %vm473_vm5, %v1091_v5, 0 }
 0x188   : > { %v1195_v14 = vmul.bf16 %v1187_v13, %v1154_v12 }
 0x18a   : > { %1450 = vmatmul.mubr.msk.bf16.vlgmr.msra.gmra.mrb[8].mxu1 %vm469_vm7, %v1448_v1  ;;  %1455 = vmatmul.mubr.msk.bf16.vlgmr.msra.gmra.mrb[12].mxu0 %vm469_vm7, %v1453_v11  ;;  %v1203_v16 = vsel %vm473_vm5, %v1195_v14, 0  ;;  %v1255_v11 = vpop.permute.xlu1 %1254 }
 0x18b   : > { %1001 = vmatpush1.bf16.msra.mxu1 %v995_v7  ;;  %1105 = vmatpush1.bf16.msra.mxu0 %v1099_v45 }
 0x18c   : > { %1469 = vmatprep.subr.msk.bf16.mxu1 %vm473_vm5, %v1196_v8  ;;  %1032 = vmatprep.mubr.bf16.mxu1 %v1638_v0 }
 0x18d   : > { %1136 = vmatprep.mubr.bf16.mxu0 %v1638_v0 }
 0x192   : > { %1460 = vmatmul.mubr.msk.bf16.vlgmr.msra.gmra.mrb[12].mxu1 %vm469_vm7, %v1458_v19  ;;  %1465 = vmatmul.mubr.msk.bf16.vlgmr.msra.gmra.mrb[16].mxu0 %vm469_vm7, %v1463_v46 }
 0x193   : > { %1209 = vmatpush1.bf16.msra.mxu1 %v1203_v16  ;;  %1240 = vmatprep.mubr.bf16.mxu1 %v1638_v0 }
 0x194   : > { %1323 = vmatprep.mubr.bf16.mxu0 %v1638_v0 }
 0x19a   : > { %1470 = vmatmul.mubr.msk.bf16.vlgmr.msra.gmra.mrb[16].mxu1 %vm469_vm7, %v1468_v20 }
 0x24d   : > { %v514_v21 = vpop.f32.mrb[0].mxu1  ;;  %v564_v22 = vpop.f32.mrb[4].mxu0 }
 0x24e   : > { %v516_v23 = vpop.f32.mrb[1].mxu1  ;;  %v565_v24 = vadd.f32 %v564_v22, %v514_v21  ;;  %v566_v25 = vpop.f32.mrb[5].mxu0  ;;  %v1573_v21 = vld [vmem:[%s2045_s5] sm:$0xff]  }
 0x24f   : > { %v518_v26 = vpop.f32.mrb[2].mxu1  ;;  %v567_v59 = vadd.f32 %v566_v25, %v516_v23  ;;  %v568_v63 = vpop.f32.mrb[6].mxu0 }
 0x250   : > { %v519_v27 = vpop.f32.mrb[3].mxu1  ;;  %v569_v28 = vpop.f32.mrb[7].mxu0 }
 0x251   : > { %v1270_v22 = vpop.permute.xlu0 %1269  ;;  %v1275_v26 = vpop.permute.xlu1 %1274 }
 0x255   : > { %v666_v29 = vpop.f32.mrb[4].mxu1  ;;  %v770_v0 = vpop.f32.mrb[8].mxu0 }
 0x256   : > { %v673_v18 = vadd.f32 %v666_v29, %v565_v24  ;;  %v668_v30 = vpop.f32.mrb[5].mxu1  ;;  %v772_v32 = vpop.f32.mrb[9].mxu0 }
 0x257   : > { %v674_v9 = vadd.f32 %v668_v30, %v567_v59  ;;  %v670_v10 = vpop.f32.mrb[6].mxu1  ;;  %v774_v35 = vpop.f32.mrb[10].mxu0 }
 0x258   : > { %v777_v33 = vadd.f32 %v770_v0, %v673_v18  ;;  %v671_v34 = vpop.f32.mrb[7].mxu1  ;;  %v775_v37 = vpop.f32.mrb[11].mxu0 }
 0x259   : > { %v778_v36 = vadd.f32 %v772_v32, %v674_v9 }
 0x25d   : > { %v826_v17 = vpop.f32.mrb[8].mxu1  ;;  %v930_v39 = vpop.f32.mrb[12].mxu0 }
 0x25e   : > { %v833_v38 = vadd.f32 %v826_v17, %v777_v33  ;;  %v828_v15 = vpop.f32.mrb[9].mxu1  ;;  %v932_v42 = vpop.f32.mrb[13].mxu0 }
 0x25f   : > { %v834_v40 = vadd.f32 %v828_v15, %v778_v36  ;;  %v830_v41 = vpop.f32.mrb[10].mxu1  ;;  %v934_v47 = vpop.f32.mrb[14].mxu0 }
 0x260   : > { %v937_v43 = vadd.f32 %v930_v39, %v833_v38  ;;  %v831_v44 = vpop.f32.mrb[11].mxu1  ;;  %v935_v49 = vpop.f32.mrb[15].mxu0 }
 0x261   : > { %v938_v48 = vadd.f32 %v932_v42, %v834_v40 }
 0x265   : > { %v1034_v50 = vpop.f32.mrb[12].mxu1  ;;  %v1138_v53 = vpop.f32.mrb[16].mxu0 }
 0x266   : > { %v1041_v51 = vadd.f32 %v1034_v50, %v937_v43  ;;  %v1036_v52 = vpop.f32.mrb[13].mxu1  ;;  %v1140_v56 = vpop.f32.mrb[17].mxu0 }
 0x267   : > { %v1042_v54 = vadd.f32 %v1036_v52, %v938_v48  ;;  %v1038_v55 = vpop.f32.mrb[14].mxu1  ;;  %v1142_v31 = vpop.f32.mrb[18].mxu0 }
 0x268   : > { %v1145_v57 = vadd.f32 %v1138_v53, %v1041_v51  ;;  %v1039_v58 = vpop.f32.mrb[15].mxu1  ;;  %v1143_v61 = vpop.f32.mrb[19].mxu0 }
 0x269   : > { %v1146_v60 = vadd.f32 %v1140_v56, %v1042_v54 }
 0x26d   : > { %v1242_v62 = vpop.f32.mrb[16].mxu1 }
 0x26e   : > { %v1249_v1 = vadd.f32 %v1242_v62, %v1145_v57  ;;  %v1244_v5 = vpop.f32.mrb[17].mxu1 }
 0x26f   : > { %v1250_v12 = vadd.f32 %v1244_v5, %v1146_v60  ;;  %v1246_v7 = vpop.f32.mrb[18].mxu1 }
 0x270   : > { %v1257_v8 = vadd.f32 %v1255_v11, %v1249_v1  ;;  %v1247_v13 = vpop.f32.mrb[19].mxu1 }
 0x271   : > { %v1258_v45 = vadd.f32 %v1255_v11, %v1250_v12 }
 0x272   : > { %v1259_v14 = vmax.f32 %v1257_v8, 0.0 }
 0x273   : > { %v1260_v19 = vmax.f32 %v1258_v45, 0.0 }
 0x274   : > { %v1261_v46 = vpack.c.bf16 %v1259_v14, %v1259_v14 }
 0x275   : > { %v1262_v16 = vpack.c.bf16 %v1260_v19, %v1260_v19 }
 0x276   : > { %v1286_v20 = vsel %vm473_vm5, %v1261_v46, 0 }
 0x277   : > { %1472 = vmatprep.subr.msk.bf16.mxu0 %vm473_vm5, %v1262_v16 }
 0x278   : > { %1292 = vmatpush1.bf16.msra.mxu0 %v1286_v20 }
 0x27b   : > { %1473 = vmatmul.mubr.msk.bf16.vlgmr.msra.gmra.mrb[20].mxu0 %vm469_vm7, %v1573_v21 }
 0x34e   : > { %v1325_v23 = vpop.f32.mrb[20].mxu0 }
 0x34f   : > { %v1326_v24 = vadd.f32 %v1325_v23, %v1270_v22  ;;  %v1327_v25 = vpop.f32.mrb[21].mxu0 }
 0x350   : > { %v1328_v59 = vadd.f32 %v1327_v25, %v1270_v22  ;;  %v1329_v27 = vpop.f32.mrb[22].mxu0 }
 0x351   : > { %v1334_v63 = vadd.f32 %v1326_v24, %v1759_v4  ;;  %v1330_v28 = vadd.f32 %v1329_v27, %v1275_v26  ;;  %v1331_v29 = vpop.f32.mrb[23].mxu0 }
 0x352   : > { %v1335_v18 = vadd.f32 %v1328_v59, %v1755_v2  ;;  %v1332_v30 = vadd.f32 %v1331_v29, %v1275_v26 }
 0x353   : > { %v1338_v0 = vmax.f32 %v1334_v63, 0.0  ;;  %v1336_v9 = vadd.f32 %v1330_v28, %v1763_v6 }
 0x354   : > { %v1339_v10 = vmax.f32 %v1335_v18, 0.0  ;;  %v1337_v32 = vadd.f32 %v1332_v30, %v1757_v3 }
 0x355   : > { %1342 = vst [vmem:[%s298_s17] sm:$0xff] %v1338_v0  ;;  %v1340_v4 = vmax.f32 %v1336_v9, 0.0 }
 0x356   : > { %1343 = vst [vmem:[%s298_s17 + $0x8] sm:$0xff] %v1339_v10  ;;  %v1341_v33 = vmax.f32 %v1337_v32, 0.0 }
 0x357   : > { %1344 = vst [vmem:[%s298_s17 + $0x10] sm:$0xff] %v1340_v4 }
 0x358   : > { %1345 = vst [vmem:[%s298_s17 + $0x18] sm:$0xff] %v1341_v33 }
 0x359   : > { %1587 = shalt.err (!%p1584_p3)
}
 0x35a   : > { %s1588_s12 = scalar_lea.hbm %s1996_s22, 512  ;;  %s1592_s19 = scalar_lea.hbm %s2048_s8, 1024 }
 0x35b   : > { %p1589_p4 = scmp.ne.s32.totalorder %s1996_s22, %s1588_s12  ;;  %p1593_p9 = scmp.lt.u32.totalorder %s1996_s22, %s2048_s8 }
 0x35c   : > { %p1594_p10 = scmp.lt.u32.totalorder %s1592_s19, %s1588_s12  ;;  %p1596_p12 = scmp.lt.u32.totalorder %s1588_s12, %s1996_s22 }
 0x35d   : > { %p1590_p7 = pnand %p1589_p4, %p1733_p5 }
 0x35e   : > { %p1595_p11 = por %p1594_p10, %p1593_p9 }
 0x35f   : > { %p1591_p8 = pneg %p1590_p7 }
 0x360   : > { %p1597_p13 = por %p1596_p12, %p1595_p11 }
 0x362   : > { %p1598_p0 = pnand %p1597_p13, %p1591_p8 }
 0x364   : > { %1601 = shalt.err (!%p1598_p0)
}
 0x365   : > { %s1649_s23 = smov 256  }
 0x366   : > { %1481 = dma.vmem_to_hbm [thread:$0]  (%p1733_p5), %s1991_s18, 512, %s1996_s22, %s1998_s9, %s1649_s23, %s1649_s23, %s1640_s10  }
 0x367 PF: > { %p1487_p1 = scmp.ge.s32.totalorder %s1636_s30, 2  ;;  %s1375_s24 = sand.u32 1, %s1624_s27  }
 0x368   : > { %s1376_s25 = scalar_lea.sflag [#allocation3], %s1375_s24 }
 0x369   : > { %p1484_p2 = pnand %p1487_p1, %p1737_p6 }
 0x36b   : > { %1619 = dma.done.wait (!%p1484_p2), %s1376_s25, 512  }
 0x36c   : > { %1621 = vsyncadd (!%p1484_p2), %s1376_s25, 4294966784  ;;  %p18_p3 = scmp.ge.s32.totalorder %s1720_s11, 4   ;;  %s2051_s27 = smov %s1628_s28 }
 0x36d   : > { %s2052_s28 = smov %s1632_s29  ;;  %s2053_s29 = smov %s1731_s14 }
 0x36e   : > { %s2054_s30 = smov %s1720_s11  ;;  %20 = sbr.rel (!%p18_p3) target bundleno = 3 (0x3), region = 102 }
 0x375   :  { %1381 = vsyncpa [#allocation3], 1 }
 0x376   :  { %1383 = vsyncpa [#allocation3 + $0x1], 1 }

</bundles_post_ra>
